<compile_context>
chip_gen: v7x
topology: tpu7x:2x2x1
jax: 0.10.0
libtpu: 0.0.40
codegen_flags: <defaults>
</compile_context>

<pallas_src>
import functools

import jax
import jax.numpy as jnp
from jax.experimental import pallas as pl
from jax.experimental.pallas import tpu as pltpu


def _actor_kernel(n_layers, n_actions, *refs):
    """MLP forward + masked softplus, fully in VMEM for one batch tile.

    refs = (obs, w_0..w_{L-1}, b_0..b_{L-1}, out)
    w_i are pre-transposed to (in, out); b_i are (1, out).
    out is the combined [tile_b, 2*n_actions] tensor: [:, :n_actions] = mu,
    [:, n_actions:] = softplus(raw) + 1e-5.
    """
    obs_ref = refs[0]
    w_refs = refs[1:1 + n_layers]
    b_refs = refs[1 + n_layers:1 + 2 * n_layers]
    out_ref = refs[1 + 2 * n_layers]

    x = obs_ref[...].astype(jnp.float32)
    for li in range(n_layers):
        w = w_refs[li][...]                     # (in, out)
        b = b_refs[li][...]                     # (1, out) -> broadcasts over rows
        x = jnp.dot(x, w, preferred_element_type=jnp.float32) + b
        if li < n_layers - 1:
            x = jnp.maximum(x, 0.0)             # ReLU

    # One lane-masked store: lanes >= n_actions get softplus(x) + 1e-5 (scale),
    # lanes < n_actions pass through unchanged (mu).  No cross-lane slicing.
    col = jax.lax.broadcasted_iota(jnp.int32, x.shape, dimension=1)
    # numerically-stable softplus: max(x,0) + log1p(exp(-|x|))
    sp = jnp.maximum(x, 0.0) + jnp.log1p(jnp.exp(-jnp.abs(x))) + 1e-5
    out_ref[...] = jnp.where(col >= n_actions, sp, x).astype(out_ref.dtype)


def prepare_actor_params(weights, biases):
    """One-time parameter prep (hoisted out of the per-call hot path).

    Args:
      weights: PyTorch-convention weights, weight[i] has shape (out, in)
      biases:  biases, bias[i] has shape (out,)
    Returns:
      (w_t, b_2d): weights transposed to (in, out), biases reshaped to (1, out)
    """
    w_t = tuple(jnp.asarray(w, jnp.float32).T for w in weights)
    b_2d = tuple(jnp.asarray(b, jnp.float32).reshape(1, -1) for b in biases)
    return w_t, b_2d


@functools.partial(jax.jit, static_argnames=("block_b",))
def actor_forward(obs, w_t, b_2d, *, block_b=128):
    """Run the ActorNetwork trunk as a Pallas TPU kernel.

    Args:
      obs:  f32[B, obs_dim]
      w_t:  tuple of pre-transposed weights, w_t[i] shape (in, out)
      b_2d: tuple of biases, b_2d[i] shape (1, out)
      block_b: batch tile size (rows per grid step)
    Returns:
      (mu, scale): each f32[B, n_actions]
    """
    n_layers = len(w_t)
    B, obs_dim = obs.shape
    out_dim = w_t[-1].shape[1]
    n_actions = out_dim // 2

    # Tile the batch; pad to a multiple of the tile if needed (static at trace).
    bb = min(block_b, B)
    pad = (-B) % bb
    obs_p = jnp.pad(obs, ((0, pad), (0, 0))) if pad else obs
    Bp = B + pad
    grid = (Bp // bb,)

    in_specs = [pl.BlockSpec((bb, obs_dim), lambda i: (i, 0))]
    # Tiny weights/biases stay fully resident; same block for every grid step.
    for w in w_t:
        in_specs.append(pl.BlockSpec(w.shape, lambda i: (0, 0)))
    for b in b_2d:
        in_specs.append(pl.BlockSpec(b.shape, lambda i: (0, 0)))
    out_spec = pl.BlockSpec((bb, out_dim), lambda i: (i, 0))

    flops = 2 * Bp * sum(w.shape[0] * w.shape[1] for w in w_t)
    bytes_accessed = 4 * (obs_p.size
                          + sum(w.size for w in w_t)
                          + sum(b.size for b in b_2d)
                          + Bp * out_dim)
    cost = pl.CostEstimate(flops=flops,
                           transcendentals=Bp * n_actions,
                           bytes_accessed=bytes_accessed)

    kernel = functools.partial(_actor_kernel, n_layers, n_actions)
    combined = pl.pallas_call(
        kernel,
        out_shape=jax.ShapeDtypeStruct((Bp, out_dim), jnp.float32),
        grid=grid,
        in_specs=in_specs,
        out_specs=out_spec,
        compiler_params=pltpu.CompilerParams(
            dimension_semantics=("parallel",)),
        cost_estimate=cost,
    )(obs_p, *w_t, *b_2d)

    combined = combined[:B]
    mu = combined[:, :n_actions]
    scale = combined[:, n_actions:]
    # TODO(synk): the SquashedNormal (tanh-transformed Gaussian) distribution
    # object has no Pallas equivalent; the kernel emits its parameters.
    return mu, scale


def _reference_forward(obs, weights, biases):
    """Pure-JAX reference (mirrors the PyTorch module)."""
    x = obs
    n_layers = len(weights)
    for i, (w, b) in enumerate(zip(weights, biases)):
        x = x @ w.T + b
        if i < n_layers - 1:
            x = jnp.maximum(x, 0.0)
    n_actions = weights[-1].shape[0] // 2
    mu, raw = x[:, :n_actions], x[:, n_actions:]
    scale = jax.nn.softplus(raw) + 1e-5
    return mu, scale


if __name__ == "__main__":
    # Small shapes implied by the module: MLP over flat observations.
    # Batch chosen >= 128 so the batch grid + launch-overhead amortization is
    # actually exercised (per perf review); still KB-scale everywhere.
    batch = 256
    obs_dim = 16
    n_actions = 4
    n_hidden_units = 32
    n_hidden_layers = 2

    key = jax.random.PRNGKey(0)
    k_obs, key = jax.random.split(key)
    obs = jax.random.normal(k_obs, (batch, obs_dim), dtype=jnp.float32)

    # Trunk parameters: [obs_dim->h, ReLU, h->h, ReLU, h->2*n_actions]
    layer_dims = [(obs_dim, n_hidden_units)]
    for _ in range(n_hidden_layers - 1):
        layer_dims.append((n_hidden_units, n_hidden_units))
    layer_dims.append((n_hidden_units, 2 * n_actions))

    weights, biases = [], []
    for (fan_in, fan_out) in layer_dims:
        kw, kb, key = jax.random.split(key, 3)
        bound = 1.0 / jnp.sqrt(fan_in)
        weights.append(jax.random.uniform(kw, (fan_out, fan_in),
                                          minval=-bound, maxval=bound,
                                          dtype=jnp.float32))
        biases.append(jax.random.uniform(kb, (fan_out,),
                                         minval=-bound, maxval=bound,
                                         dtype=jnp.float32))

    # One-time parameter prep (hot path takes prepared params directly).
    w_t, b_2d = prepare_actor_params(weights, biases)

    mu, scale = actor_forward(obs, w_t, b_2d)
    jax.block_until_ready((mu, scale))

    # Correctness check against the pure-JAX reference.
    mu_ref, scale_ref = _reference_forward(obs, weights, biases)
    assert jnp.allclose(mu, mu_ref, atol=1e-5, rtol=1e-5)
    assert jnp.allclose(scale, scale_ref, atol=1e-5, rtol=1e-5)
    assert bool(jnp.all(scale > 0.0))

    print("KERNEL_OK")
</pallas_src>

<mosaic_0001>
module attributes {stable_mosaic.version = 11 : i64} {
  func.func @_actor_kernel(%arg0: i32, %arg1: memref<128x16xf32, #tpu.memory_space<vmem>>, %arg2: memref<16x32xf32, #tpu.memory_space<vmem>>, %arg3: memref<32x32xf32, #tpu.memory_space<vmem>>, %arg4: memref<32x8xf32, #tpu.memory_space<vmem>>, %arg5: memref<1x32xf32, #tpu.memory_space<vmem>>, %arg6: memref<1x32xf32, #tpu.memory_space<vmem>>, %arg7: memref<1x8xf32, #tpu.memory_space<vmem>>, %arg8: memref<128x8xf32, #tpu.memory_space<vmem>>) attributes {dimension_semantics = [#tpu.dimension_semantics<parallel>], iteration_bounds = array<i64: 2>, scalar_prefetch = 0 : i64, scratch_operands = 0 : i64, tpu.core_type = #tpu.core_type<tc>, window_params = [{transform_indices = @transform_0, window_bounds = array<i64: 128, 16>}, {pipeline_mode = #tpu.pipeline_mode<synchronous>, transform_indices = @transform_1, window_bounds = array<i64: 16, 32>}, {pipeline_mode = #tpu.pipeline_mode<synchronous>, transform_indices = @transform_2, window_bounds = array<i64: 32, 32>}, {pipeline_mode = #tpu.pipeline_mode<synchronous>, transform_indices = @transform_3, window_bounds = array<i64: 32, 8>}, {pipeline_mode = #tpu.pipeline_mode<synchronous>, transform_indices = @transform_4, window_bounds = array<i64: 1, 32>}, {pipeline_mode = #tpu.pipeline_mode<synchronous>, transform_indices = @transform_5, window_bounds = array<i64: 1, 32>}, {pipeline_mode = #tpu.pipeline_mode<synchronous>, transform_indices = @transform_6, window_bounds = array<i64: 1, 8>}, {transform_indices = @transform_7, window_bounds = array<i64: 128, 8>}]} {
    %c0 = arith.constant 0 : index
    %c0_0 = arith.constant 0 : index
    %0 = vector.load %arg1[%c0, %c0_0] : memref<128x16xf32, #tpu.memory_space<vmem>>, vector<128x16xf32>
    %c0_1 = arith.constant 0 : index
    %c0_2 = arith.constant 0 : index
    %1 = vector.load %arg2[%c0_1, %c0_2] : memref<16x32xf32, #tpu.memory_space<vmem>>, vector<16x32xf32>
    %c0_3 = arith.constant 0 : index
    %c0_4 = arith.constant 0 : index
    %2 = vector.load %arg5[%c0_3, %c0_4] : memref<1x32xf32, #tpu.memory_space<vmem>>, vector<1x32xf32>
    %cst = arith.constant dense<0.000000e+00> : vector<128x32xf32>
    %3 = tpu.matmul %0, %1, %cst {dimension_numbers = #tpu.dot_dimension_numbers<[1], [0], [0], [1], [0, 0, 1, 1], [], []>} : vector<128x16xf32>, vector<16x32xf32>, vector<128x32xf32> -> vector<128x32xf32>
    %4 = vector.broadcast %2 : vector<1x32xf32> to vector<128x32xf32>
    %5 = arith.addf %3, %4 : vector<128x32xf32>
    %cst_5 = arith.constant 0.000000e+00 : f32
    %6 = vector.broadcast %cst_5 : f32 to vector<128x32xf32>
    %7 = arith.maximumf %5, %6 : vector<128x32xf32>
    %c0_6 = arith.constant 0 : index
    %c0_7 = arith.constant 0 : index
    %8 = vector.load %arg3[%c0_6, %c0_7] : memref<32x32xf32, #tpu.memory_space<vmem>>, vector<32x32xf32>
    %c0_8 = arith.constant 0 : index
    %c0_9 = arith.constant 0 : index
    %9 = vector.load %arg6[%c0_8, %c0_9] : memref<1x32xf32, #tpu.memory_space<vmem>>, vector<1x32xf32>
    %cst_10 = arith.constant dense<0.000000e+00> : vector<128x32xf32>
    %10 = tpu.matmul %7, %8, %cst_10 {dimension_numbers = #tpu.dot_dimension_numbers<[1], [0], [0], [1], [0, 0, 1, 1], [], []>} : vector<128x32xf32>, vector<32x32xf32>, vector<128x32xf32> -> vector<128x32xf32>
    %11 = vector.broadcast %9 : vector<1x32xf32> to vector<128x32xf32>
    %12 = arith.addf %10, %11 : vector<128x32xf32>
    %cst_11 = arith.constant 0.000000e+00 : f32
    %13 = vector.broadcast %cst_11 : f32 to vector<128x32xf32>
    %14 = arith.maximumf %12, %13 : vector<128x32xf32>
    %c0_12 = arith.constant 0 : index
    %c0_13 = arith.constant 0 : index
    %15 = vector.load %arg4[%c0_12, %c0_13] : memref<32x8xf32, #tpu.memory_space<vmem>>, vector<32x8xf32>
    %c0_14 = arith.constant 0 : index
    %c0_15 = arith.constant 0 : index
    %16 = vector.load %arg7[%c0_14, %c0_15] : memref<1x8xf32, #tpu.memory_space<vmem>>, vector<1x8xf32>
    %cst_16 = arith.constant dense<0.000000e+00> : vector<128x8xf32>
    %17 = tpu.matmul %14, %15, %cst_16 {dimension_numbers = #tpu.dot_dimension_numbers<[1], [0], [0], [1], [0, 0, 1, 1], [], []>} : vector<128x32xf32>, vector<32x8xf32>, vector<128x8xf32> -> vector<128x8xf32>
    %18 = vector.broadcast %16 : vector<1x8xf32> to vector<128x8xf32>
    %19 = arith.addf %17, %18 : vector<128x8xf32>
    %20 = tpu.iota {dimensions = array<i32: 1>} : vector<128x8xi32>
    %cst_17 = arith.constant 0.000000e+00 : f32
    %21 = vector.broadcast %cst_17 : f32 to vector<128x8xf32>
    %22 = arith.maximumf %19, %21 : vector<128x8xf32>
    %23 = math.absf %19 : vector<128x8xf32>
    %cst_18 = arith.constant 0.000000e+00 : f32
    %24 = vector.broadcast %cst_18 : f32 to vector<128x8xf32>
    %25 = arith.subf %24, %23 : vector<128x8xf32>
    %26 = math.exp %25 : vector<128x8xf32>
    %27 = math.log1p %26 : vector<128x8xf32>
    %28 = arith.addf %22, %27 : vector<128x8xf32>
    %cst_19 = arith.constant 9.99999974E-6 : f32
    %29 = vector.broadcast %cst_19 : f32 to vector<128x8xf32>
    %30 = arith.addf %28, %29 : vector<128x8xf32>
    %c4_i32 = arith.constant 4 : i32
    %31 = vector.broadcast %c4_i32 : i32 to vector<128x8xi32>
    %32 = arith.cmpi sge, %20, %31 : vector<128x8xi32>
    %33 = arith.select %32, %30, %19 : vector<128x8xi1>, vector<128x8xf32>
    %c0_20 = arith.constant 0 : index
    %c0_21 = arith.constant 0 : index
    %34 = vector.load %arg8[%c0_20, %c0_21] : memref<128x8xf32, #tpu.memory_space<vmem>>, vector<128x8xf32>
    tpu.vector_store %arg8[%c0_20, %c0_21], %33 {strides = array<i32>} : memref<128x8xf32, #tpu.memory_space<vmem>>, vector<128x8xf32>,
    return
  }
  func.func @transform_0(%arg0: i32) -> (i32, i32) {
    %c0_i32 = arith.constant 0 : i32
    %c0_i32_0 = arith.constant 0 : i32
    return %arg0, %c0_i32 : i32, i32
  }
  func.func @transform_1(%arg0: i32) -> (i32, i32) {
    %c0_i32 = arith.constant 0 : i32
    %c0_i32_0 = arith.constant 0 : i32
    %c0_i32_1 = arith.constant 0 : i32
    return %c0_i32, %c0_i32_0 : i32, i32
  }
  func.func @transform_2(%arg0: i32) -> (i32, i32) {
    %c0_i32 = arith.constant 0 : i32
    %c0_i32_0 = arith.constant 0 : i32
    %c0_i32_1 = arith.constant 0 : i32
    return %c0_i32, %c0_i32_0 : i32, i32
  }
  func.func @transform_3(%arg0: i32) -> (i32, i32) {
    %c0_i32 = arith.constant 0 : i32
    %c0_i32_0 = arith.constant 0 : i32
    %c0_i32_1 = arith.constant 0 : i32
    return %c0_i32, %c0_i32_0 : i32, i32
  }
  func.func @transform_4(%arg0: i32) -> (i32, i32) {
    %c0_i32 = arith.constant 0 : i32
    %c0_i32_0 = arith.constant 0 : i32
    %c0_i32_1 = arith.constant 0 : i32
    return %c0_i32, %c0_i32_0 : i32, i32
  }
  func.func @transform_5(%arg0: i32) -> (i32, i32) {
    %c0_i32 = arith.constant 0 : i32
    %c0_i32_0 = arith.constant 0 : i32
    %c0_i32_1 = arith.constant 0 : i32
    return %c0_i32, %c0_i32_0 : i32, i32
  }
  func.func @transform_6(%arg0: i32) -> (i32, i32) {
    %c0_i32 = arith.constant 0 : i32
    %c0_i32_0 = arith.constant 0 : i32
    %c0_i32_1 = arith.constant 0 : i32
    return %c0_i32, %c0_i32_0 : i32, i32
  }
  func.func @transform_7(%arg0: i32) -> (i32, i32) {
    %c0_i32 = arith.constant 0 : i32
    %c0_i32_0 = arith.constant 0 : i32
    return %arg0, %c0_i32 : i32, i32
  }
}

</mosaic_0001>

<bundles_post_ra>
// kernel: actor_forward.1
= control target key start
LH: loop header
LB: loop body
LE: loop exit
PB: predicated region body
PF: predicated region fallthrough
CT: control target
= control target key end

     0   :  { %s1644_s24 = smov 0   ;;  %s2047_s0 = inlined_call_operand.vmem [shape: f32[256,16], index: 0, kind: input, shape index: {}]   ;;  %s2048_s1 = inlined_call_operand.vmem [shape: f32[16,32], index: 1, kind: input, shape index: {}]   ;;  %s2049_s2 = inlined_call_operand.vmem [shape: f32[32,32], index: 2, kind: input, shape index: {}]   ;;  %s2050_s3 = inlined_call_operand.vmem [shape: f32[32,8], index: 3, kind: input, shape index: {}]   ;;  %s2051_s4 = inlined_call_operand.vmem [shape: f32[1,32], index: 4, kind: input, shape index: {}]   ;;  %s2052_s5 = inlined_call_operand.vmem [shape: f32[1,32], index: 5, kind: input, shape index: {}]   ;;  %s2053_s6 = inlined_call_operand.vmem [shape: f32[1,8], index: 6, kind: input, shape index: {}]   ;;  %s2054_s7 = inlined_call_operand.vmem [shape: f32[256,8], index: 7, kind: output, shape index: {}]  }
   0x1 LB: > { %s1290_s25 = sadd.s32 4294967295, %s1602_s24   ;;  %p1294_p0 = scmp.ge.s32.totalorder %s1602_s24, 1  ;;  %s1602_s24 = sphi %s1644_s24, %s17_s24  }
   0x2   : > { %p238_p1 = scmp.lt.s32.totalorder %s1602_s24, 3 }
   0x4   : > { %p239_p2 = pnand %p1294_p0, %p238_p1 }
   0x5   : > { %v298_v0 = vld [vmem:[%s2048_s1] sm:$0xff] (!%p239_p2)  ;;  %v299_v1 = vld [vmem:[%s2048_s1 + $0x8] sm:$0xff] (!%p239_p2)  ;;  %s1295_s30 = sshll.u32 (!%p239_p2), %s1290_s25, 4  ;;  %vm307_vm0 = vcmask (!%p239_p2), 130048   ;;  %v519_v6 = vld [vmem:[%s2049_s2 + $0x10] sm:$0xff] (!%p239_p2)  ;;  %vm528_vm1 = vcmask (!%p239_p2), 261120  }
   0x6   : > { %242 = sbr.rel (%p239_p2) target bundleno = 758 (0x2f6), region = 48  ;;  %v517_v2 = vld [vmem:[%s2049_s2] sm:$0xff] (!%p239_p2)  ;;  %v1502_v3 = vpack.c.bf16 (!%p239_p2), %v299_v1, %v298_v0  ;;  %p271_p3 = scmp.lt.s32.totalorder (!%p239_p2), %s1295_s30, 31  ;;  %v518_v4 = vld [vmem:[%s2049_s2 + $0x8] sm:$0xff] (!%p239_p2)  ;;  %v520_v7 = vld [vmem:[%s2049_s2 + $0x18] sm:$0xff] (!%p239_p2)  ;;  %vm1217_vm5 = vcmask (!%p239_p2), 64512  }
   0x7   : > { %v1506_v5 = vpack.c.bf16 (!%p239_p2), %v518_v4, %v517_v2  ;;  %v1510_v12 = vpack.c.bf16 (!%p239_p2), %v520_v7, %v519_v6  ;;  %v738_v25 = vld [vmem:[%s2050_s3] sm:$0xff] (!%p239_p2)  ;;  %v739_v26 = vld [vmem:[%s2050_s3 + $0x8] sm:$0xff] (!%p239_p2)  ;;  %v740_v27 = vld [vmem:[%s2050_s3 + $0x10] sm:$0xff] (!%p239_p2) }
   0x8   : > { %1503 = vmatprep.subr.bf16.mxu0 (!%p239_p2), %v1502_v3  ;;  %1522 = vmatprep.subr.bf16.mxu1 (!%p239_p2), %v1502_v3  ;;  %v1514_v28 = vpack.c.bf16 (!%p239_p2), %v739_v26, %v738_v25  ;;  %v741_v29 = vld [vmem:[%s2050_s3 + $0x18] sm:$0xff] (!%p239_p2)  ;;  %v1299_v31 = vld [vmem:[%s2051_s4] ss:$0 sm:$0xff] (!%p239_p2) }
   0x9   : > { %1505 = vmatpush3.bf16.msra.mxu0 (!%p239_p2), %v1502_v3  ;;  %1523 = vmatpush3.bf16.msra.mxu1 (!%p239_p2), %v1502_v3  ;;  %v1518_v30 = vpack.c.bf16 (!%p239_p2), %v741_v29, %v740_v27 }
   0xa   : > { %1507 = vmatprep.subr.bf16.mxu1 (!%p239_p2), %v1506_v5  ;;  %1515 = vmatprep.subr.bf16.mxu0 (!%p239_p2), %v1514_v28 }
   0xd   : > { %s2070_s30 = smov (!%p271_p3, %s1295_s30), 31 }
   0xe   : > { %s1296_s12 = sshll.u32 %s2070_s30, 3 }
   0xf   : > { %s1672_s15 = scalar_lea.vmem %s2047_s0, %s1296_s12  ;;  %s1873_s16 = scalar_lea.vmem %s2054_s7, %s1296_s12 }
  0x10   : > { %v282_v8 = vld [vmem:[%s1672_s15] sm:$0xff]  ;;  %v283_v9 = vld [vmem:[%s1672_s15 + $0x8] sm:$0xff]  ;;  %v284_v10 = vld [vmem:[%s1672_s15 + $0x10] sm:$0xff] }
  0x11   : > { %1414 = vmatprep.mubr.msk.f32.mxu0 %vm307_vm0, %v282_v8  ;;  %v290_v11 = vld [vmem:[%s1672_s15 + $0x40] sm:$0xff]  ;;  %v285_v13 = vld [vmem:[%s1672_s15 + $0x18] sm:$0xff]  ;;  %v291_v14 = vld [vmem:[%s1672_s15 + $0x48] sm:$0xff] }
  0x12   : > { %1415 = vmatmul.mubr.msk.f32.vlgmr.msra.gmra.mrb[0].mxu0 %vm307_vm0, %v283_v9  ;;  %1426 = vmatprep.mubr.msk.f32.mxu1 %vm307_vm0, %v290_v11  ;;  %v292_v15 = vld [vmem:[%s1672_s15 + $0x50] sm:$0xff]  ;;  %v286_v16 = vld [vmem:[%s1672_s15 + $0x20] sm:$0xff]  ;;  %v293_v17 = vld [vmem:[%s1672_s15 + $0x58] sm:$0xff] }
  0x13   : > { %1417 = vmatprep.mubr.msk.f32.mxu0 %vm307_vm0, %v284_v10  ;;  %1427 = vmatmul.mubr.msk.f32.vlgmr.msra.gmra.mrb[0].mxu1 %vm307_vm0, %v291_v14  ;;  %v294_v18 = vld [vmem:[%s1672_s15 + $0x60] sm:$0xff]  ;;  %v287_v19 = vld [vmem:[%s1672_s15 + $0x28] sm:$0xff]  ;;  %v288_v20 = vld [vmem:[%s1672_s15 + $0x30] sm:$0xff] }
  0x14   : > { %1429 = vmatprep.mubr.msk.f32.mxu1 %vm307_vm0, %v292_v15  ;;  %1509 = vmatpush3.bf16.msra.mxu1 %v1506_v5  ;;  %v295_v21 = vld [vmem:[%s1672_s15 + $0x68] sm:$0xff]  ;;  %v296_v22 = vld [vmem:[%s1672_s15 + $0x70] sm:$0xff]  ;;  %v289_v23 = vld [vmem:[%s1672_s15 + $0x38] sm:$0xff] }
  0x15   : > { %1511 = vmatprep.subr.bf16.mxu1 %v1510_v12  ;;  %v297_v24 = vld [vmem:[%s1672_s15 + $0x78] sm:$0xff]  ;;  %1517 = vmatpush3.bf16.msra.mxu0 %v1514_v28 }
  0x16   : > { %1418 = vmatmul.mubr.msk.f32.gmra.mrb[2].mxu0 %vm307_vm0, %v285_v13  ;;  %1519 = vmatprep.subr.bf16.mxu0 %v1518_v30 }
  0x17   : > { %1420 = vmatprep.mubr.msk.f32.mxu0 %vm307_vm0, %v286_v16  ;;  %1430 = vmatmul.mubr.msk.f32.gmra.mrb[2].mxu1 %vm307_vm0, %v293_v17  ;;  %v1316_v16 = vld [vmem:[%s2052_s5] ss:$0 sm:$0xff] }
  0x18   : > { %1432 = vmatprep.mubr.msk.f32.mxu1 %vm307_vm0, %v294_v18  ;;  %1513 = vmatpush3.bf16.msra.mxu1 %v1510_v12 }
  0x19   : > { %1521 = vmatpush3.bf16.msra.mxu0 %v1518_v30 }
  0x1a   : > { %1421 = vmatmul.mubr.msk.f32.gmra.mrb[4].mxu0 %vm307_vm0, %v287_v19 }
  0x1b   : > { %1423 = vmatprep.mubr.msk.f32.mxu0 %vm307_vm0, %v288_v20  ;;  %1433 = vmatmul.mubr.msk.f32.gmra.mrb[4].mxu1 %vm307_vm0, %v295_v21 }
  0x1c   : > { %1435 = vmatprep.mubr.msk.f32.mxu1 %vm307_vm0, %v296_v22 }
  0x1e   : > { %1424 = vmatmul.mubr.msk.f32.gmra.mrb[6].mxu0 %vm307_vm0, %v289_v23 }
  0x1f   : > { %1436 = vmatmul.mubr.msk.f32.gmra.mrb[6].mxu1 %vm307_vm0, %v297_v24 }
  0xe5   : > { %v1416_v32 = vpop.f32.mrb[0].mxu0 }
  0xe6   : > { %v428_v33 = vadd.f32 %v1416_v32, %v1299_v31  ;;  %v422_v34 = vpop.f32.mrb[1].mxu0  ;;  %v1428_v36 = vpop.f32.mrb[0].mxu1 }
  0xe7   : > { %v423_v35 = vadd.f32 %v1299_v31, %v422_v34  ;;  %v462_v37 = vpop.f32.mrb[1].mxu1  ;;  %v468_v3 = vadd.f32 %v1428_v36, %v1299_v31 }
  0xe8   : > { %v502_v40 = vmax.f32 %v428_v33, 0.0  ;;  %v463_v56 = vadd.f32 %v1299_v31, %v462_v37 }
  0xe9   : > { %v501_v38 = vmax.f32 %v423_v35, 0.0  ;;  %v1419_v39 = vpop.f32.mrb[2].mxu0  ;;  %v510_v6 = vmax.f32 %v468_v3, 0.0 }
  0xea   : > { %v438_v41 = vadd.f32 %v1419_v39, %v1299_v31  ;;  %v432_v42 = vpop.f32.mrb[3].mxu0  ;;  %v1431_v44 = vpop.f32.mrb[2].mxu1  ;;  %v509_v0 = vmax.f32 %v463_v56, 0.0 }
  0xeb   : > { %v433_v43 = vadd.f32 %v1299_v31, %v432_v42  ;;  %1446 = vmatprep.mubr.msk.f32.mxu1 %vm528_vm1, %v501_v38  ;;  %v472_v45 = vpop.f32.mrb[3].mxu1  ;;  %v478_v7 = vadd.f32 %v1431_v44, %v1299_v31 }
  0xec   : > { %1447 = vmatmul.mubr.msk.f32.vlgmr.msra.gmra.mrb[8].mxu1 %vm528_vm1, %v502_v40  ;;  %v504_v48 = vmax.f32 %v438_v41, 0.0  ;;  %v473_v1 = vadd.f32 %v1299_v31, %v472_v45 }
  0xed   : > { %v503_v46 = vmax.f32 %v433_v43, 0.0  ;;  %v1422_v47 = vpop.f32.mrb[4].mxu0  ;;  %v512_v10 = vmax.f32 %v478_v7, 0.0 }
  0xee   : > { %v448_v49 = vadd.f32 %v1422_v47, %v1299_v31  ;;  %v442_v50 = vpop.f32.mrb[5].mxu0  ;;  %v1434_v52 = vpop.f32.mrb[4].mxu1  ;;  %v511_v4 = vmax.f32 %v473_v1, 0.0  ;;  %v1765_v1 = vld [vmem:[%s2053_s6] ss:$0 sm:$0xff] }
  0xef   : > { %v443_v51 = vadd.f32 %v1299_v31, %v442_v50  ;;  %1449 = vmatprep.mubr.msk.f32.mxu1 %vm528_vm1, %v503_v46  ;;  %v482_v53 = vpop.f32.mrb[5].mxu1  ;;  %v488_v11 = vadd.f32 %v1434_v52, %v1299_v31 }
  0xf0   : > { %1450 = vmatmul.mubr.msk.f32.gmra.mrb[10].mxu1 %vm528_vm1, %v504_v48  ;;  %v506_v57 = vmax.f32 %v448_v49, 0.0  ;;  %v483_v5 = vadd.f32 %v1299_v31, %v482_v53 }
  0xf1   : > { %v505_v54 = vmax.f32 %v443_v51, 0.0  ;;  %v1425_v55 = vpop.f32.mrb[6].mxu0  ;;  %v514_v13 = vmax.f32 %v488_v11, 0.0 }
  0xf2   : > { %v458_v58 = vadd.f32 %v1425_v55, %v1299_v31  ;;  %v452_v59 = vpop.f32.mrb[7].mxu0  ;;  %v1437_v61 = vpop.f32.mrb[6].mxu1  ;;  %v513_v8 = vmax.f32 %v483_v5, 0.0 }
  0xf3   : > { %v453_v60 = vadd.f32 %v1299_v31, %v452_v59  ;;  %1452 = vmatprep.mubr.msk.f32.mxu1 %vm528_vm1, %v505_v54  ;;  %v492_v62 = vpop.f32.mrb[7].mxu1  ;;  %v498_v14 = vadd.f32 %v1437_v61, %v1299_v31 }
  0xf4   : > { %1453 = vmatmul.mubr.msk.f32.gmra.mrb[12].mxu1 %vm528_vm1, %v506_v57  ;;  %v508_v2 = vmax.f32 %v458_v58, 0.0  ;;  %v493_v9 = vadd.f32 %v1299_v31, %v492_v62 }
  0xf5   : > { %v507_v63 = vmax.f32 %v453_v60, 0.0  ;;  %v516_v15 = vmax.f32 %v498_v14, 0.0 }
  0xf6   : > { %v515_v12 = vmax.f32 %v493_v9, 0.0 }
  0xf7   : > { %1455 = vmatprep.mubr.msk.f32.mxu1 %vm528_vm1, %v507_v63 }
  0xf8   : > { %1456 = vmatmul.mubr.msk.f32.gmra.mrb[14].mxu1 %vm528_vm1, %v508_v2 }
  0xf9   : > { %1458 = vmatprep.mubr.msk.f32.mxu1 %vm528_vm1, %v509_v0 }
  0xfc   : > { %1459 = vmatmul.mubr.msk.f32.gmra.mrb[16].mxu1 %vm528_vm1, %v510_v6 }
  0xfd   : > { %1461 = vmatprep.mubr.msk.f32.mxu1 %vm528_vm1, %v511_v4 }
 0x100   : > { %1462 = vmatmul.mubr.msk.f32.gmra.mrb[18].mxu1 %vm528_vm1, %v512_v10 }
 0x101   : > { %1464 = vmatprep.mubr.msk.f32.mxu1 %vm528_vm1, %v513_v8 }
 0x104   : > { %1465 = vmatmul.mubr.msk.f32.gmra.mrb[20].mxu1 %vm528_vm1, %v514_v13 }
 0x105   : > { %1467 = vmatprep.mubr.msk.f32.mxu1 %vm528_vm1, %v515_v12 }
 0x108   : > { %1468 = vmatmul.mubr.msk.f32.gmra.mrb[22].mxu1 %vm528_vm1, %v516_v15 }
 0x1bf   : > { %v1448_v17 = vpop.f32.mrb[8].mxu1 }
 0x1c0   : > { %v649_v18 = vadd.f32 %v1448_v17, %v1316_v16  ;;  %v643_v19 = vpop.f32.mrb[9].mxu1 }
 0x1c1   : > { %v644_v20 = vadd.f32 %v1316_v16, %v643_v19 }
 0x1c2   : > { %v723_v23 = vmax.f32 %v649_v18, 0.0 }
 0x1c3   : > { %v722_v21 = vmax.f32 %v644_v20, 0.0  ;;  %v1451_v22 = vpop.f32.mrb[10].mxu1 }
 0x1c4   : > { %v659_v24 = vadd.f32 %v1451_v22, %v1316_v16  ;;  %v653_v25 = vpop.f32.mrb[11].mxu1 }
 0x1c5   : > { %v654_v26 = vadd.f32 %v1316_v16, %v653_v25  ;;  %1478 = vmatprep.mubr.msk.f32.mxu0 %vm528_vm1, %v722_v21 }
 0x1c6   : > { %1479 = vmatmul.mubr.msk.f32.vlgmr.msra.gmra.mrb[8].mxu0 %vm528_vm1, %v723_v23  ;;  %v725_v29 = vmax.f32 %v659_v24, 0.0 }
 0x1c7   : > { %v724_v27 = vmax.f32 %v654_v26, 0.0  ;;  %v1454_v28 = vpop.f32.mrb[12].mxu1 }
 0x1c8   : > { %v669_v30 = vadd.f32 %v1454_v28, %v1316_v16  ;;  %v663_v31 = vpop.f32.mrb[13].mxu1 }
 0x1c9   : > { %v664_v32 = vadd.f32 %v1316_v16, %v663_v31  ;;  %1481 = vmatprep.mubr.msk.f32.mxu0 %vm528_vm1, %v724_v27 }
 0x1ca   : > { %1482 = vmatmul.mubr.msk.f32.gmra.mrb[10].mxu0 %vm528_vm1, %v725_v29  ;;  %v727_v35 = vmax.f32 %v669_v30, 0.0 }
 0x1cb   : > { %v726_v33 = vmax.f32 %v664_v32, 0.0  ;;  %v1457_v34 = vpop.f32.mrb[14].mxu1 }
 0x1cc   : > { %v679_v36 = vadd.f32 %v1457_v34, %v1316_v16  ;;  %v673_v37 = vpop.f32.mrb[15].mxu1  ;;  %v942_v34 = vlaneseq }
 0x1cd   : > { %v674_v38 = vadd.f32 %v1316_v16, %v673_v37  ;;  %1484 = vmatprep.mubr.msk.f32.mxu0 %vm528_vm1, %v726_v33 }
 0x1ce   : > { %1485 = vmatmul.mubr.msk.f32.gmra.mrb[12].mxu0 %vm528_vm1, %v727_v35  ;;  %v729_v41 = vmax.f32 %v679_v36, 0.0 }
 0x1cf   : > { %v728_v39 = vmax.f32 %v674_v38, 0.0  ;;  %v1460_v40 = vpop.f32.mrb[16].mxu1 }
 0x1d0   : > { %v689_v42 = vadd.f32 %v1460_v40, %v1316_v16  ;;  %v683_v43 = vpop.f32.mrb[17].mxu1 }
 0x1d1   : > { %v684_v44 = vadd.f32 %v1316_v16, %v683_v43  ;;  %1487 = vmatprep.mubr.msk.f32.mxu0 %vm528_vm1, %v728_v39  ;;  %v1799_v43 = vand.u32 127, %v942_v34 }
 0x1d2   : > { %1488 = vmatmul.mubr.msk.f32.gmra.mrb[14].mxu0 %vm528_vm1, %v729_v41  ;;  %v731_v47 = vmax.f32 %v689_v42, 0.0 }
 0x1d3   : > { %v730_v45 = vmax.f32 %v684_v44, 0.0  ;;  %v1463_v46 = vpop.f32.mrb[18].mxu1  ;;  %vm1200_vm4 = vcmp.ge.s32.totalorder %v1799_v43, 4 }
 0x1d4   : > { %v699_v48 = vadd.f32 %v1463_v46, %v1316_v16  ;;  %v693_v49 = vpop.f32.mrb[19].mxu1 }
 0x1d5   : > { %v694_v50 = vadd.f32 %v1316_v16, %v693_v49  ;;  %1490 = vmatprep.mubr.msk.f32.mxu0 %vm528_vm1, %v730_v45 }
 0x1d6   : > { %1491 = vmatmul.mubr.msk.f32.gmra.mrb[16].mxu0 %vm528_vm1, %v731_v47  ;;  %v733_v53 = vmax.f32 %v699_v48, 0.0 }
 0x1d7   : > { %v732_v51 = vmax.f32 %v694_v50, 0.0  ;;  %v1466_v52 = vpop.f32.mrb[20].mxu1 }
 0x1d8   : > { %v709_v54 = vadd.f32 %v1466_v52, %v1316_v16  ;;  %v703_v55 = vpop.f32.mrb[21].mxu1 }
 0x1d9   : > { %v704_v56 = vadd.f32 %v1316_v16, %v703_v55  ;;  %1493 = vmatprep.mubr.msk.f32.mxu0 %vm528_vm1, %v732_v51 }
 0x1da   : > { %1494 = vmatmul.mubr.msk.f32.gmra.mrb[18].mxu0 %vm528_vm1, %v733_v53  ;;  %v735_v59 = vmax.f32 %v709_v54, 0.0 }
 0x1db   : > { %v734_v57 = vmax.f32 %v704_v56, 0.0  ;;  %v1469_v58 = vpop.f32.mrb[22].mxu1 }
 0x1dc   : > { %v719_v60 = vadd.f32 %v1469_v58, %v1316_v16  ;;  %v713_v61 = vpop.f32.mrb[23].mxu1 }
 0x1dd   : > { %v714_v62 = vadd.f32 %v1316_v16, %v713_v61  ;;  %1496 = vmatprep.mubr.msk.f32.mxu0 %vm528_vm1, %v734_v57 }
 0x1de   : > { %1497 = vmatmul.mubr.msk.f32.gmra.mrb[20].mxu0 %vm528_vm1, %v735_v59  ;;  %v737_v0 = vmax.f32 %v719_v60, 0.0 }
 0x1df   : > { %v736_v63 = vmax.f32 %v714_v62, 0.0 }
 0x1e1   : > { %1499 = vmatprep.mubr.msk.f32.mxu0 %vm528_vm1, %v736_v63 }
 0x1e2   : > { %1500 = vmatmul.mubr.msk.f32.gmra.mrb[22].mxu0 %vm528_vm1, %v737_v0 }
 0x299   : > { %v1480_v2 = vpop.f32.mrb[8].mxu0 }
 0x29a   : > { %v1768_v3 = vadd.f32 %v1480_v2, %v1765_v1  ;;  %v863_v4 = vpop.f32.mrb[9].mxu0 }
 0x29b   : > { %v1771_v5 = vadd.f32 %v1765_v1, %v863_v4 }
 0x29c   : > { %v961_v6 = vand.u32 2147483647, %v1768_v3  ;;  %v945_v47 = vmax.f32 %v1768_v3, 0.0 }
 0x29d   : > { %v960_v7 = vand.u32 2147483647, %v1771_v5  ;;  %v1483_v8 = vpop.f32.mrb[10].mxu0  ;;  %v944_v49 = vmax.f32 %v1771_v5, 0.0 }
 0x29e   : > { %v977_v9 = vsub.f32 0.0, %v961_v6  ;;  %v1776_v10 = vadd.f32 %v1483_v8, %v1765_v1  ;;  %v873_v11 = vpop.f32.mrb[11].mxu0 }
 0x29f   : > { %v976_v12 = vsub.f32 0.0, %v960_v7  ;;  %v1779_v13 = vadd.f32 %v1765_v1, %v873_v11 }
 0x2a0   : > { %v994_v14 = vmul.f32 1.442695, %v977_v9  ;;  %v963_v15 = vand.u32 2147483647, %v1776_v10  ;;  %v947_v50 = vmax.f32 %v1776_v10, 0.0 }
 0x2a1   : > { %v992_v16 = vmul.f32 1.442695, %v976_v12  ;;  %v962_v17 = vand.u32 2147483647, %v1779_v13  ;;  %v1486_v18 = vpop.f32.mrb[12].mxu0  ;;  %v946_v56 = vmax.f32 %v1779_v13, 0.0 }
 0x2a2   : > { %1532 = vpow2.f32 %v994_v14  ;;  %v979_v19 = vsub.f32 0.0, %v963_v15  ;;  %v1784_v20 = vadd.f32 %v1486_v18, %v1765_v1  ;;  %v883_v21 = vpop.f32.mrb[13].mxu0 }
 0x2a3   : > { %1534 = vpow2.f32 %v992_v16  ;;  %v978_v22 = vsub.f32 0.0, %v962_v17  ;;  %v1787_v23 = vadd.f32 %v1765_v1, %v883_v21 }
 0x2a4   : > { %v998_v24 = vmul.f32 1.442695, %v979_v19  ;;  %v965_v25 = vand.u32 2147483647, %v1784_v20  ;;  %v949_v4 = vmax.f32 %v1784_v20, 0.0 }
 0x2a5   : > { %v996_v26 = vmul.f32 1.442695, %v978_v22  ;;  %v964_v27 = vand.u32 2147483647, %v1787_v23  ;;  %v1489_v28 = vpop.f32.mrb[14].mxu0  ;;  %v948_v6 = vmax.f32 %v1787_v23, 0.0 }
 0x2a6   : > { %1536 = vpow2.f32 %v998_v24  ;;  %v981_v29 = vsub.f32 0.0, %v965_v25  ;;  %v1792_v30 = vadd.f32 %v1489_v28, %v1765_v1  ;;  %v893_v31 = vpop.f32.mrb[15].mxu0 }
 0x2a7   : > { %1538 = vpow2.f32 %v996_v26  ;;  %v980_v32 = vsub.f32 0.0, %v964_v27  ;;  %v1795_v33 = vadd.f32 %v1765_v1, %v893_v31 }
 0x2a8   : > { %v1002_v35 = vmul.f32 1.442695, %v981_v29  ;;  %v967_v36 = vand.u32 2147483647, %v1792_v30  ;;  %v951_v28 = vmax.f32 %v1792_v30, 0.0 }
 0x2a9   : > { %v1000_v37 = vmul.f32 1.442695, %v980_v32  ;;  %v1492_v38 = vpop.f32.mrb[16].mxu0  ;;  %v966_v41 = vand.u32 2147483647, %v1795_v33 }
 0x2aa   : > { %1540 = vpow2.f32 %v1002_v35  ;;  %v983_v39 = vsub.f32 0.0, %v967_v36  ;;  %v903_v40 = vpop.f32.mrb[17].mxu0  ;;  %v1802_v45 = vadd.f32 %v1492_v38, %v1765_v1 }
 0x2ab   : > { %1542 = vpow2.f32 %v1000_v37  ;;  %v982_v57 = vsub.f32 0.0, %v966_v41  ;;  %v1812_v62 = vadd.f32 %v1765_v1, %v903_v40 }
 0x2ac   : > { %v1533_v42 = vpop.eup %1532  ;;  %v1006_v44 = vmul.f32 1.442695, %v983_v39  ;;  %v969_v61 = vand.u32 2147483647, %v1802_v45 }
 0x2ad   : > { %v1535_v46 = vpop.eup %1534  ;;  %v1033_v48 = vadd.f32 1.0, %v1533_v42  ;;  %v1036_v51 = vmul.f32 -0.5, %v1533_v42  ;;  %v1495_v54 = vpop.f32.mrb[18].mxu0  ;;  %v1039_v55 = vand.u32 2147483647, %v1533_v42 }
 0x2ae   : > { %v1024_v52 = vadd.f32 1.0, %v1535_v46  ;;  %v1027_v53 = vmul.f32 -0.5, %v1535_v46  ;;  %1544 = vpow2.f32 %v1006_v44  ;;  %v1808_v58 = vpop.f32.mrb[19].mxu0  ;;  %v1030_v60 = vand.u32 2147483647, %v1535_v46 }
 0x2af   : > { %1546 = vlog2.f32 %v1033_v48  ;;  %v1037_v8 = vadd.f32 1.0, %v1036_v51  ;;  %vm1820_vm2 = vcmp.lt.f32.partialorder %v1039_v55, 0.0004427343  ;;  %v1004_v17 = vmul.f32 1.442695, %v982_v57 }
 0x2b0   : > { %v1537_v59 = vpop.eup %1536  ;;  %1548 = vlog2.f32 %v1024_v52  ;;  %v1028_v9 = vadd.f32 1.0, %v1027_v53  ;;  %vm1824_vm3 = vcmp.lt.f32.partialorder %v1030_v60, 0.0004427343  ;;  %v985_v21 = vsub.f32 0.0, %v969_v61 }
 0x2b1   : > { %v1539_v63 = vpop.eup %1538  ;;  %v1051_v0 = vadd.f32 1.0, %v1537_v59  ;;  %v1054_v2 = vmul.f32 -0.5, %v1537_v59  ;;  %v1816_v7 = vpop.f32.mrb[20].mxu0  ;;  %v1057_v16 = vand.u32 2147483647, %v1537_v59  ;;  %v1038_v31 = vmul.f32 %v1533_v42, %v1037_v8 }
 0x2b2   : > { %v1042_v11 = vadd.f32 1.0, %v1539_v63  ;;  %v1045_v12 = vmul.f32 -0.5, %v1539_v63  ;;  %v1818_v14 = vpop.f32.mrb[21].mxu0  ;;  %v968_v22 = vand.u32 2147483647, %v1812_v62  ;;  %v1029_v32 = vmul.f32 %v1535_v46, %v1028_v9 }
 0x2b3   : > { %1550 = vlog2.f32 %v1051_v0  ;;  %v1055_v25 = vadd.f32 1.0, %v1054_v2  ;;  %v1048_v26 = vand.u32 2147483647, %v1539_v63  ;;  %vm1838_vm6 = vcmp.lt.f32.partialorder %v1057_v16, 0.0004427343 }
 0x2b4   : > { %v1541_v18 = vpop.eup %1540  ;;  %1552 = vlog2.f32 %v1042_v11  ;;  %v1046_v34 = vadd.f32 1.0, %v1045_v12  ;;  %v984_v39 = vsub.f32 0.0, %v968_v22  ;;  %v1010_v42 = vmul.f32 1.442695, %v985_v21 }
 0x2b5   : > { %v1829_v24 = vpop.eup %1542  ;;  %v1069_v27 = vadd.f32 1.0, %v1541_v18  ;;  %v1832_v29 = vpop.f32.mrb[22].mxu0  ;;  %v1072_v38 = vmul.f32 -0.5, %v1541_v18  ;;  %v1075_v41 = vand.u32 2147483647, %v1541_v18  ;;  %v1845_v44 = vadd.f32 %v1495_v54, %v1765_v1 }
 0x2b6   : > { %v1060_v35 = vadd.f32 1.0, %v1829_v24  ;;  %v1836_v36 = vpop.f32.mrb[23].mxu0  ;;  %v1056_v48 = vmul.f32 %v1537_v59, %v1055_v25  ;;  %vm1847_vm7 = vcmp.lt.f32.partialorder %v1048_v26, 0.0004427343  ;;  %v1063_v52 = vmul.f32 -0.5, %v1829_v24 }
 0x2b7   : > { %1554 = vlog2.f32 %v1069_v27  ;;  %v1047_v60 = vmul.f32 %v1539_v63, %v1046_v34  ;;  %v1008_v61 = vmul.f32 1.442695, %v984_v39  ;;  %v1073_v2 = vadd.f32 1.0, %v1072_v38 }
 0x2b8   : > { %v1842_v40 = vpop.eup %1544  ;;  %1556 = vlog2.f32 %v1060_v35  ;;  %v1066_v54 = vand.u32 2147483647, %v1829_v24  ;;  %vm1856_vm8 = vcmp.lt.f32.partialorder %v1075_v41, 0.0004427343  ;;  %v971_v9 = vand.u32 2147483647, %v1845_v44 }
 0x2b9   : > { %v1547_v46 = vpop.eup %1546  ;;  %v1087_v53 = vadd.f32 1.0, %v1842_v40  ;;  %1558 = vpow2.f32 %v1004_v17  ;;  %v1064_v16 = vadd.f32 1.0, %v1063_v52  ;;  %v1090_v17 = vmul.f32 -0.5, %v1842_v40 }
 0x2ba   : > { %v1549_v55 = vpop.eup %1548  ;;  %v1035_v57 = vmul.f32 0.6931472, %v1547_v46  ;;  %v987_v25 = vsub.f32 0.0, %v971_v9  ;;  %v1074_v26 = vmul.f32 %v1541_v18, %v1073_v2  ;;  %vm1875_vm9 = vcmp.lt.f32.partialorder %v1066_v54, 0.0004427343 }
 0x2bb   : > { %v1026_v0 = vmul.f32 0.6931472, %v1549_v55  ;;  %1560 = vlog2.f32 %v1087_v53  ;;  %v1883_v34 = vadd.f32 %v1765_v1, %v1808_v58  ;;  %v1091_v41 = vadd.f32 1.0, %v1090_v17 }
 0x2bc   : > { %v1041_v59 = vsel %vm1820_vm2, %v1038_v31, %v1035_v57  ;;  %1562 = vpow2.f32 %v1010_v42  ;;  %v1093_v51 = vand.u32 2147483647, %v1842_v40  ;;  %v1910_v55 = vadd.f32 %v1816_v7, %v1765_v1 }
 0x2bd   : > { %v1551_v11 = vpop.eup %1550  ;;  %v1169_v63 = vadd.f32 %v1041_v59, %v945_v47  ;;  %v1032_v12 = vsel %vm1824_vm3, %v1029_v32, %v1026_v0  ;;  %1564 = vpow2.f32 %v1008_v61  ;;  %v1014_v32 = vmul.f32 1.442695, %v987_v25 }
 0x2be   : > { %v1553_v21 = vpop.eup %1552  ;;  %v1168_v15 = vadd.f32 %v1032_v12, %v944_v49  ;;  %v1053_v22 = vmul.f32 0.6931472, %v1551_v11  ;;  %vm1094_vm10 = vcmp.lt.f32.partialorder %v1093_v51, 0.0004427343  ;;  %v973_v12 = vand.u32 2147483647, %v1910_v55 }
 0x2bf   : > { %v1185_v47 = vadd.f32 1e-05, %v1169_v63  ;;  %v1044_v19 = vmul.f32 0.6931472, %v1553_v21  ;;  %1566 = vpow2.f32 %v1014_v32 }
 0x2c0   : > { %v1184_v31 = vadd.f32 1e-05, %v1168_v15  ;;  %v1059_v49 = vsel %vm1838_vm6, %v1056_v48, %v1053_v22  ;;  %v1065_v48 = vmul.f32 %v1829_v24, %v1064_v16 }
 0x2c1   : > { %v1555_v35 = vpop.eup %1554  ;;  %v1202_v38 = vsel %vm1200_vm4, %v1185_v47, %v1768_v3  ;;  %v1171_v18 = vadd.f32 %v1059_v49, %v947_v50  ;;  %v1050_v39 = vsel %vm1847_vm7, %v1047_v60, %v1044_v19  ;;  %v989_v19 = vsub.f32 0.0, %v973_v12 }
 0x2c2   : > { %v1557_v42 = vpop.eup %1556  ;;  %1219 = vst.msk [vmem:[%s1873_s16 + $0x8] sm:$0xff] %vm1217_vm5, %v1202_v38  ;;  %v1201_v58 = vsel %vm1200_vm4, %v1184_v31, %v1771_v5  ;;  %v1170_v37 = vadd.f32 %v1050_v39, %v946_v56  ;;  %v1071_v46 = vmul.f32 0.6931472, %v1555_v35  ;;  %v970_v56 = vand.u32 2147483647, %v1883_v34 }
 0x2c3   : > { %1218 = vst.msk [vmem:[%s1873_s16] sm:$0xff] %vm1217_vm5, %v1201_v58  ;;  %v1187_v3 = vadd.f32 1e-05, %v1171_v18  ;;  %v1062_v50 = vmul.f32 0.6931472, %v1557_v42  ;;  %v1903_v52 = vpop.eup %1558  ;;  %v953_v31 = vmax.f32 %v1802_v45, 0.0  ;;  %v1969_v38 = vadd.f32 %v1832_v29, %v1765_v1 }
 0x2c4   : > { %v1186_v53 = vadd.f32 1e-05, %v1170_v37  ;;  %v1077_v5 = vsel %vm1856_vm8, %v1074_v26, %v1071_v46  ;;  %v1078_v0 = vadd.f32 1.0, %v1903_v52  ;;  %v1081_v17 = vmul.f32 -0.5, %v1903_v52 }
 0x2c5   : > { %v1561_v57 = vpop.eup %1560  ;;  %v1204_v24 = vsel %vm1200_vm4, %v1187_v3, %v1776_v10  ;;  %v1173_v60 = vadd.f32 %v1077_v5, %v949_v4  ;;  %v1068_v61 = vsel %vm1875_vm9, %v1065_v48, %v1062_v50  ;;  %v1092_v4 = vmul.f32 %v1842_v40, %v1091_v41 }
 0x2c6   : > { %v1920_v2 = vpop.eup %1562  ;;  %1221 = vst.msk [vmem:[%s1873_s16 + $0x18] sm:$0xff] %vm1217_vm5, %v1204_v24  ;;  %v1203_v7 = vsel %vm1200_vm4, %v1186_v53, %v1779_v13  ;;  %v1172_v54 = vadd.f32 %v1068_v61, %v948_v6  ;;  %v1089_v10 = vmul.f32 0.6931472, %v1561_v57  ;;  %1568 = vlog2.f32 %v1078_v0 }
 0x2c7   : > { %1220 = vst.msk [vmem:[%s1873_s16 + $0x10] sm:$0xff] %vm1217_vm5, %v1203_v7  ;;  %v1189_v59 = vadd.f32 1e-05, %v1173_v60  ;;  %v1105_v8 = vadd.f32 1.0, %v1920_v2  ;;  %v1933_v9 = vpop.eup %1564  ;;  %v986_v13 = vsub.f32 0.0, %v970_v56  ;;  %v1108_v15 = vmul.f32 -0.5, %v1920_v2 }
 0x2c8   : > { %v1188_v11 = vadd.f32 1e-05, %v1172_v54  ;;  %v1095_v63 = vsel %vm1094_vm10, %v1092_v4, %v1089_v10  ;;  %v1084_v25 = vand.u32 2147483647, %v1903_v52  ;;  %v950_v26 = vmax.f32 %v1795_v33, 0.0 }
 0x2c9   : > { %v1206_v6 = vsel %vm1200_vm4, %v1189_v59, %v1784_v20  ;;  %v1175_v40 = vadd.f32 %v1095_v63, %v951_v28  ;;  %1570 = vlog2.f32 %v1105_v8  ;;  %v1096_v20 = vadd.f32 1.0, %v1933_v9  ;;  %v1955_v22 = vpop.eup %1566 }
 0x2ca   : > { %1223 = vst.msk [vmem:[%s1873_s16 + $0x28] sm:$0xff] %vm1217_vm5, %v1206_v6  ;;  %v1205_v16 = vsel %vm1200_vm4, %v1188_v11, %v1787_v23  ;;  %v1953_v28 = vadd.f32 %v1765_v1, %v1818_v14  ;;  %v1012_v47 = vmul.f32 1.442695, %v986_v13  ;;  %v1082_v27 = vadd.f32 1.0, %v1081_v17 }
 0x2cb   : > { %1222 = vst.msk [vmem:[%s1873_s16 + $0x20] sm:$0xff] %vm1217_vm5, %v1205_v16  ;;  %v1191_v21 = vadd.f32 1e-05, %v1175_v40  ;;  %1572 = vlog2.f32 %v1096_v20  ;;  %v1123_v14 = vadd.f32 1.0, %v1955_v22  ;;  %v1109_v49 = vadd.f32 1.0, %v1108_v15 }
 0x2cc   : > { %1574 = vpow2.f32 %v1012_v47  ;;  %v1018_v32 = vmul.f32 1.442695, %v989_v19  ;;  %v972_v35 = vand.u32 2147483647, %v1953_v28  ;;  %vm1971_vm11 = vcmp.lt.f32.partialorder %v1084_v25, 0.0004427343 }
 0x2cd   : > { %v1208_v23 = vsel %vm1200_vm4, %v1191_v21, %v1792_v30  ;;  %v1099_v18 = vmul.f32 -0.5, %v1933_v9  ;;  %1576 = vlog2.f32 %v1123_v14  ;;  %v1978_v39 = vadd.f32 %v1765_v1, %v1836_v36 }
 0x2ce   : > { %1225 = vst.msk [vmem:[%s1873_s16 + $0x38] sm:$0xff] %vm1217_vm5, %v1208_v23  ;;  %v1111_v42 = vand.u32 2147483647, %v1920_v2  ;;  %1578 = vpow2.f32 %v1018_v32  ;;  %v988_v58 = vsub.f32 0.0, %v972_v35  ;;  %v975_v37 = vand.u32 2147483647, %v1969_v38 }
 0x2cf   : > { %v1083_v46 = vmul.f32 %v1903_v52, %v1082_v27  ;;  %v1126_v3 = vmul.f32 -0.5, %v1955_v22  ;;  %v974_v50 = vand.u32 2147483647, %v1978_v39  ;;  %v1110_v51 = vmul.f32 %v1920_v2, %v1109_v49 }
 0x2d0   : > { %v1569_v41 = vpop.eup %1568  ;;  %v1102_v1 = vand.u32 2147483647, %v1933_v9  ;;  %v1016_v36 = vmul.f32 1.442695, %v988_v58  ;;  %v991_v53 = vsub.f32 0.0, %v975_v37  ;;  %v1100_v57 = vadd.f32 1.0, %v1099_v18 }
 0x2d1   : > { %v1080_v29 = vmul.f32 0.6931472, %v1569_v41  ;;  %v990_v24 = vsub.f32 0.0, %v974_v50  ;;  %vm1112_vm12 = vcmp.lt.f32.partialorder %v1111_v42, 0.0004427343  ;;  %v1127_v0 = vadd.f32 1.0, %v1126_v3 }
 0x2d2   : > { %1580 = vpow2.f32 %v1016_v36  ;;  %v1022_v52 = vmul.f32 1.442695, %v991_v53  ;;  %v952_v4 = vmax.f32 %v1812_v62, 0.0  ;;  %v1101_v11 = vmul.f32 %v1933_v9, %v1100_v57 }
 0x2d3   : > { %v1571_v48 = vpop.eup %1570  ;;  %v1086_v5 = vsel %vm1971_vm11, %v1083_v46, %v1080_v29  ;;  %v1020_v7 = vmul.f32 1.442695, %v990_v24  ;;  %v1129_v63 = vand.u32 2147483647, %v1955_v22  ;;  %vm1103_vm13 = vcmp.lt.f32.partialorder %v1102_v1, 0.0004427343 }
 0x2d4   : > { %v1107_v56 = vmul.f32 0.6931472, %v1571_v48  ;;  %v1174_v60 = vadd.f32 %v1086_v5, %v950_v26  ;;  %1582 = vpow2.f32 %v1022_v52  ;;  %v1128_v17 = vmul.f32 %v1955_v22, %v1127_v0 }
 0x2d5   : > { %v1573_v54 = vpop.eup %1572  ;;  %1584 = vpow2.f32 %v1020_v7  ;;  %vm1130_vm14 = vcmp.lt.f32.partialorder %v1129_v63, 0.0004427343  ;;  %v954_v50 = vmax.f32 %v1883_v34, 0.0  ;;  %v957_v57 = vmax.f32 %v1910_v55, 0.0 }
 0x2d6   : > { %v1113_v61 = vsel %vm1112_vm12, %v1110_v51, %v1107_v56  ;;  %v1190_v2 = vadd.f32 1e-05, %v1174_v60  ;;  %v1575_v59 = vpop.eup %1574  ;;  %v1098_v8 = vmul.f32 0.6931472, %v1573_v54 }
 0x2d7   : > { %v1177_v10 = vadd.f32 %v1113_v61, %v953_v31  ;;  %v1114_v6 = vadd.f32 1.0, %v1575_v59  ;;  %v1577_v40 = vpop.eup %1576  ;;  %v1117_v22 = vmul.f32 -0.5, %v1575_v59  ;;  %v1120_v41 = vand.u32 2147483647, %v1575_v59 }
 0x2d8   : > { %v1207_v13 = vsel %vm1200_vm4, %v1190_v2, %v1795_v33  ;;  %v1104_v16 = vsel %vm1103_vm13, %v1101_v11, %v1098_v8  ;;  %v1579_v21 = vpop.eup %1578  ;;  %v1125_v20 = vmul.f32 0.6931472, %v1577_v40  ;;  %v955_v33 = vmax.f32 %v1845_v44, 0.0 }
 0x2d9   : > { %v1193_v12 = vadd.f32 1e-05, %v1177_v10  ;;  %1224 = vst.msk [vmem:[%s1873_s16 + $0x30] sm:$0xff] %vm1217_vm5, %v1207_v13  ;;  %v1176_v15 = vadd.f32 %v1104_v16, %v952_v4  ;;  %1586 = vlog2.f32 %v1114_v6  ;;  %v1141_v25 = vadd.f32 1.0, %v1579_v21 }
 0x2da   : > { %v1131_v19 = vsel %vm1130_vm14, %v1128_v17, %v1125_v20  ;;  %v1144_v49 = vmul.f32 -0.5, %v1579_v21  ;;  %v1118_v30 = vadd.f32 1.0, %v1117_v22  ;;  %v1147_v3 = vand.u32 2147483647, %v1579_v21 }
 0x2db   : > { %v1210_v9 = vsel %vm1200_vm4, %v1193_v12, %v1802_v45  ;;  %v1192_v47 = vadd.f32 1e-05, %v1176_v15  ;;  %v1179_v23 = vadd.f32 %v1131_v19, %v955_v33  ;;  %1588 = vlog2.f32 %v1141_v25 }
 0x2dc   : > { %1227 = vst.msk [vmem:[%s1873_s16 + $0x48] sm:$0xff] %vm1217_vm5, %v1210_v9  ;;  %v1581_v26 = vpop.eup %1580  ;;  %v1145_v58 = vadd.f32 1.0, %v1144_v49  ;;  %v1119_v46 = vmul.f32 %v1575_v59, %v1118_v30  ;;  %vm1121_vm15 = vcmp.lt.f32.partialorder %v1120_v41, 0.0004427343  ;;  %vm1148_vm0 = vcmp.lt.f32.partialorder %v1147_v3, 0.0004427343 }
 0x2dd   : > { %v1209_v45 = vsel %vm1200_vm4, %v1192_v47, %v1812_v62  ;;  %v1195_v27 = vadd.f32 1e-05, %v1179_v23  ;;  %v1132_v31 = vadd.f32 1.0, %v1581_v26  ;;  %v1135_v37 = vmul.f32 -0.5, %v1581_v26 }
 0x2de   : > { %1226 = vst.msk [vmem:[%s1873_s16 + $0x40] sm:$0xff] %vm1217_vm5, %v1209_v45  ;;  %v1583_v14 = vpop.eup %1582  ;;  %v1146_v5 = vmul.f32 %v1579_v21, %v1145_v58  ;;  %v1138_v24 = vand.u32 2147483647, %v1581_v26  ;;  %v956_v13 = vmax.f32 %v1953_v28, 0.0  ;;  %v959_v12 = vmax.f32 %v1969_v38, 0.0 }
 0x2df   : > { %v1585_v32 = vpop.eup %1584  ;;  %v1212_v35 = vsel %vm1200_vm4, %v1195_v27, %v1845_v44  ;;  %1590 = vlog2.f32 %v1132_v31  ;;  %v1159_v18 = vadd.f32 1.0, %v1583_v14  ;;  %v1162_v48 = vmul.f32 -0.5, %v1583_v14 }
 0x2e0   : > { %1229 = vst.msk [vmem:[%s1873_s16 + $0x58] sm:$0xff] %vm1217_vm5, %v1212_v35  ;;  %v1150_v42 = vadd.f32 1.0, %v1585_v32  ;;  %v1153_v1 = vmul.f32 -0.5, %v1585_v32  ;;  %v1136_v56 = vadd.f32 1.0, %v1135_v37  ;;  %v1165_v0 = vand.u32 2147483647, %v1583_v14 }
 0x2e1   : > { %1592 = vlog2.f32 %v1159_v18  ;;  %v1163_v61 = vadd.f32 1.0, %v1162_v48  ;;  %v1156_v8 = vand.u32 2147483647, %v1585_v32  ;;  %vm1139_vm1 = vcmp.lt.f32.partialorder %v1138_v24, 0.0004427343 }
 0x2e2   : > { %1594 = vlog2.f32 %v1150_v42  ;;  %v1154_v2 = vadd.f32 1.0, %v1153_v1  ;;  %v1137_v59 = vmul.f32 %v1581_v26, %v1136_v56  ;;  %vm1166_vm2 = vcmp.lt.f32.partialorder %v1165_v0, 0.0004427343 }
 0x2e3   : > { %v1587_v62 = vpop.eup %1586  ;;  %v1164_v17 = vmul.f32 %v1583_v14, %v1163_v61  ;;  %v958_v33 = vmax.f32 %v1978_v39, 0.0  ;;  %vm1157_vm3 = vcmp.lt.f32.partialorder %v1156_v8, 0.0004427343 }
 0x2e4   : > { %v1116_v29 = vmul.f32 0.6931472, %v1587_v62  ;;  %v1155_v15 = vmul.f32 %v1585_v32, %v1154_v2 }
 0x2e5   : > { %v1589_v44 = vpop.eup %1588 }
 0x2e6   : > { %v1122_v51 = vsel %vm1121_vm15, %v1119_v46, %v1116_v29  ;;  %v1143_v53 = vmul.f32 0.6931472, %v1589_v44 }
 0x2e7   : > { %v1178_v36 = vadd.f32 %v1122_v51, %v954_v50 }
 0x2e8   : > { %v1149_v52 = vsel %vm1148_vm0, %v1146_v5, %v1143_v53 }
 0x2e9   : > { %v1194_v60 = vadd.f32 1e-05, %v1178_v36  ;;  %v1591_v7 = vpop.eup %1590  ;;  %v1181_v54 = vadd.f32 %v1149_v52, %v957_v57 }
 0x2ea   : > { %v1134_v4 = vmul.f32 0.6931472, %v1591_v7 }
 0x2eb   : > { %v1211_v10 = vsel %vm1200_vm4, %v1194_v60, %v1883_v34  ;;  %v1593_v11 = vpop.eup %1592  ;;  %v1197_v63 = vadd.f32 1e-05, %v1181_v54 }
 0x2ec   : > { %1228 = vst.msk [vmem:[%s1873_s16 + $0x50] sm:$0xff] %vm1217_vm5, %v1211_v10  ;;  %v1595_v6 = vpop.eup %1594  ;;  %v1140_v40 = vsel %vm1139_vm1, %v1137_v59, %v1134_v4  ;;  %v1161_v16 = vmul.f32 0.6931472, %v1593_v11 }
 0x2ed   : > { %v1214_v34 = vsel %vm1200_vm4, %v1197_v63, %v1910_v55  ;;  %v1180_v21 = vadd.f32 %v1140_v40, %v956_v13  ;;  %v1152_v9 = vmul.f32 0.6931472, %v1595_v6 }
 0x2ee   : > { %1231 = vst.msk [vmem:[%s1873_s16 + $0x68] sm:$0xff] %vm1217_vm5, %v1214_v34  ;;  %v1167_v20 = vsel %vm1166_vm2, %v1164_v17, %v1161_v16 }
 0x2ef   : > { %v1196_v25 = vadd.f32 1e-05, %v1180_v21  ;;  %v1183_v47 = vadd.f32 %v1167_v20, %v959_v12  ;;  %v1158_v19 = vsel %vm1157_vm3, %v1155_v15, %v1152_v9 }
 0x2f0   : > { %v1182_v23 = vadd.f32 %v1158_v19, %v958_v33 }
 0x2f1   : > { %v1213_v22 = vsel %vm1200_vm4, %v1196_v25, %v1953_v28  ;;  %v1199_v55 = vadd.f32 1e-05, %v1183_v47 }
 0x2f2   : > { %1230 = vst.msk [vmem:[%s1873_s16 + $0x60] sm:$0xff] %vm1217_vm5, %v1213_v22  ;;  %v1198_v26 = vadd.f32 1e-05, %v1182_v23 }
 0x2f3   : > { %v1216_v45 = vsel %vm1200_vm4, %v1199_v55, %v1969_v38 }
 0x2f4   : > { %1233 = vst.msk [vmem:[%s1873_s16 + $0x78] sm:$0xff] %vm1217_vm5, %v1216_v45  ;;  %v1215_v27 = vsel %vm1200_vm4, %v1198_v26, %v1978_v39 }
 0x2f5   : > { %1232 = vst.msk [vmem:[%s1873_s16 + $0x70] sm:$0xff] %vm1217_vm5, %v1215_v27 }
 0x2f6 PF: > { %s17_s24 = sadd.s32 1, %s1602_s24  }
 0x2f7   : > { %p14_p4 = scmp.ge.s32.totalorder %s17_s24, 4  }
 0x2f9   :  { %16 = sbr.rel (!%p14_p4) target bundleno = 1 (0x1), region = 78 }

</bundles_post_ra>
